<compile_context>
chip_gen: v5e
topology: v5e:2x2
jax: 0.10.0
libtpu: 0.0.40
codegen_flags: <defaults>
</compile_context>

<pallas_src>
import jax
import jax.numpy as jnp
from jax.experimental import pallas as pl
from jax.experimental.pallas import tpu as pltpu

HIDDEN = 32


def _round_up(n, m):
    return ((n + m - 1) // m) * m


def _cdiv(a, b):
    return -(-a // b)


def critic_kernel(xp_ref, w1b_ref, b1b_ref, w2b_ref, b2_ref, out_ref):
    # xp_ref : (rows, G*S)  f32        packed x tile, G samples per row (streamed)
    # w1b_ref: (G*S, G*H)   bf16|f32   block-diag(W1 x G)                (resident)
    # b1b_ref: (1,   G*H)   f32        b1 tiled G times                  (resident)
    # w2b_ref: (G*H, G)     f32        block-diag(W2 x G)                (resident)
    # b2_ref : (1, 1)       f32        SMEM scalar
    # out_ref: (rows, G)    f32        one value per packed sample
    w1b = w1b_ref[...]
    xb = xp_ref[...].astype(w1b.dtype)                               # in-kernel cast (VPU)
    h = jnp.dot(xb, w1b, preferred_element_type=jnp.float32)         # (rows, G*H)
    h = jnp.maximum(h + b1b_ref[...], 0.0)                           # bias + ReLU in f32
    v = jnp.dot(h, w2b_ref[...], preferred_element_type=jnp.float32)  # (rows, G)
    out_ref[...] = v + b2_ref[0, 0]


def critic_forward(x, w1, b1, w2, b2, *, tile_b=32768, bf16_inputs=True,
                   vmem_budget_bytes=24 * 1024 * 1024):
    """Pallas forward pass. x: (B, state_num) f32 -> (B, 1) f32."""
    B, S = x.shape
    H = w1.shape[1]
    assert b1.shape == (H,), (b1.shape, H)
    assert w2.shape == (H, 1), (w2.shape, H)
    assert b2.shape == (1,), b2.shape

    # Pack G samples per row so the layer-1 contraction axis (G*S lanes) is
    # ~lane-dense (G*S == 128 for state_num=16).
    G = max(1, _cdiv(128, S))
    align = 128 * G                      # tile granularity: rows stay a multiple of 8*16

    # ---- choose the batch tile: as large as the VMEM budget allows, balanced so
    #      the last tile carries little padding, and >= 2 grid steps when possible.
    lanes_x = _round_up(G * S, 128)
    lanes_h = _round_up(G * H, 128)
    xbytes = 2 if bf16_inputs else 4
    per_group = (2 * 128 * lanes_x * 4       # double-buffered x blocks
                 + 2 * 128 * 128 * 4         # double-buffered output blocks (lane padded)
                 + 2 * 128 * lanes_h * 4     # hidden activation (+ ReLU copy)
                 + 128 * lanes_x * xbytes)   # in-kernel bf16/f32 copy of x
    cap_groups = max(1, min(max(1, tile_b // align), vmem_budget_bytes // max(1, per_group)))

    n_groups = _cdiv(B, align)
    steps = _cdiv(n_groups, cap_groups)
    per = _cdiv(n_groups, steps)             # groups per tile (balanced -> minimal padding)
    if steps == 1 and per >= 2:
        # Keep >=2 "parallel" steps so both v7x TensorCores get work (no-op v5e/v6e).
        per = _cdiv(per, 2)
        steps = _cdiv(n_groups, per)
    tb = per * align
    Bp = steps * tb

    if Bp != B:
        # Padding is a real copy; feed B as a multiple of 128*G (typical power-of-2
        # PPO rollout sizes) to keep the hot path copy-free.
        x = jnp.pad(x, ((0, Bp - B), (0, 0)))
    xp = x.reshape(Bp // G, G * S)           # free reshape: row r holds samples r*G .. r*G+G-1

    # Tiny (<=128 KiB) block-diagonal weight expansions; in a training loop these
    # would be built once per parameter update, not per forward call.
    w_dtype = jnp.bfloat16 if bf16_inputs else jnp.float32
    eye = jnp.eye(G, dtype=jnp.float32)
    w1f = w1.astype(jnp.float32)
    w1b = jnp.einsum("ge,sh->gseh", eye, w1f).reshape(G * S, G * H).astype(w_dtype)
    w2b = jnp.einsum("ge,h->ghe", eye, w2[:, 0].astype(jnp.float32)).reshape(G * H, G)
    b1b = jnp.tile(b1.astype(jnp.float32), G).reshape(1, G * H)
    b2s = b2.reshape(1, 1).astype(jnp.float32)

    rows = tb // G
    out = pl.pallas_call(
        critic_kernel,
        out_shape=jax.ShapeDtypeStruct((Bp // G, G), jnp.float32),
        grid=(steps,),
        in_specs=[
            pl.BlockSpec((rows, G * S), lambda i: (i, 0)),       # packed x (streamed)
            pl.BlockSpec((G * S, G * H), lambda i: (0, 0)),      # block-diag W1 (resident)
            pl.BlockSpec((1, G * H), lambda i: (0, 0)),          # tiled b1 (resident)
            pl.BlockSpec((G * H, G), lambda i: (0, 0)),          # block-diag W2 (resident)
            pl.BlockSpec(memory_space=pltpu.MemorySpace.SMEM),   # b2 scalar
        ],
        out_specs=pl.BlockSpec((rows, G), lambda i: (i, 0)),
        compiler_params=pltpu.CompilerParams(
            dimension_semantics=("parallel",),   # batch tiles are independent
            vmem_limit_bytes=32 * 1024 * 1024,   # > v5e's 16 MiB default, << v7x 64 MiB physical
        ),
    )(xp, w1b, b1b, w2b, b2s)

    # TODO(synk): if the consumer accepts a flat (B,) value vector, return
    # out.reshape(Bp)[:B] directly and skip the final reshape pass.
    return out.reshape(Bp)[:B].reshape(B, 1)


def critic_forward_auto(x, w1, b1, w2, b2, *, min_pallas_batch=4096):
    """Dispatch: small/medium batches are cheaper as plain fused XLA; large
    batches stream through the Pallas kernel."""
    if x.shape[0] < min_pallas_batch:
        return jnp.maximum(x @ w1 + b1, 0.0) @ w2 + b2
    return critic_forward(x, w1, b1, w2, b2)


def init_params(key, state_num, hidden=HIDDEN):
    # Mimics PyTorch nn.Linear default init: U[-1/sqrt(fan_in), 1/sqrt(fan_in)].
    k1, k2, k3, k4 = jax.random.split(key, 4)
    lim1 = 1.0 / jnp.sqrt(jnp.float32(state_num))
    lim2 = 1.0 / jnp.sqrt(jnp.float32(hidden))
    w1 = jax.random.uniform(k1, (state_num, hidden), jnp.float32, -lim1, lim1)
    b1 = jax.random.uniform(k2, (hidden,), jnp.float32, -lim1, lim1)
    w2 = jax.random.uniform(k3, (hidden, 1), jnp.float32, -lim2, lim2)
    b2 = jax.random.uniform(k4, (1,), jnp.float32, -lim2, lim2)
    return w1, b1, w2, b2


def _ref_f32(x, w1, b1, w2, b2):
    return jnp.maximum(x @ w1 + b1, 0.0) @ w2 + b2


def _ref_bf16(x, w1, b1, w2, b2):
    # Matches kernel numerics: bf16 first-layer inputs/weights, f32 accumulation.
    h = jnp.dot(x.astype(jnp.bfloat16), w1.astype(jnp.bfloat16),
                preferred_element_type=jnp.float32) + b1
    h = jnp.maximum(h, 0.0)
    return jnp.dot(h, w2, preferred_element_type=jnp.float32) + b2


if __name__ == "__main__":
    key = jax.random.PRNGKey(0)
    k_x, k_x2, k_x3, k_p = jax.random.split(key, 4)

    state_num = 16
    w1, b1, w2, b2 = init_params(k_p, state_num)

    # Small, module-consistent shape (single padded tile).
    batch = 2
    x = jax.random.normal(k_x, (batch, state_num), jnp.float32)
    out = jax.block_until_ready(critic_forward(x, w1, b1, w2, b2))
    assert out.shape == (batch, 1)
    assert jnp.allclose(out, _ref_bf16(x, w1, b1, w2, b2), atol=5e-3, rtol=5e-3)
    assert jnp.allclose(out, _ref_f32(x, w1, b1, w2, b2), atol=5e-2, rtol=5e-2)

    # Multi-tile grid with a padded last tile (2 steps of 1024).
    batch2 = 1536
    x2 = jax.random.normal(k_x2, (batch2, state_num), jnp.float32)
    out2 = jax.block_until_ready(critic_forward(x2, w1, b1, w2, b2))
    assert out2.shape == (batch2, 1)
    assert jnp.allclose(out2, _ref_bf16(x2, w1, b1, w2, b2), atol=5e-3, rtol=5e-3)
    assert jnp.allclose(out2, _ref_f32(x2, w1, b1, w2, b2), atol=5e-2, rtol=5e-2)

    # Tile-aligned batch: copy-free packing path, 2 parallel grid steps, no padding.
    batch3 = 2048
    x3 = jax.random.normal(k_x3, (batch3, state_num), jnp.float32)
    out3 = jax.block_until_ready(critic_forward(x3, w1, b1, w2, b2))
    assert out3.shape == (batch3, 1)
    assert jnp.allclose(out3, _ref_bf16(x3, w1, b1, w2, b2), atol=5e-3, rtol=5e-3)
    assert jnp.allclose(out3, _ref_f32(x3, w1, b1, w2, b2), atol=5e-2, rtol=5e-2)

    print("KERNEL_OK")
</pallas_src>

<mosaic_0001>
module attributes {stable_mosaic.version = 11 : i64} {
  func.func @critic_kernel(%arg0: i32, %arg1: memref<128x128xf32, #tpu.memory_space<vmem>>, %arg2: memref<128x256xbf16, #tpu.memory_space<vmem>>, %arg3: memref<1x256xf32, #tpu.memory_space<vmem>>, %arg4: memref<256x8xf32, #tpu.memory_space<vmem>>, %arg5: memref<1x1xf32, #tpu.memory_space<smem>>, %arg6: memref<128x8xf32, #tpu.memory_space<vmem>>) attributes {dimension_semantics = [#tpu.dimension_semantics<parallel>], iteration_bounds = array<i64: 1>, scalar_prefetch = 0 : i64, scratch_operands = 0 : i64, tpu.core_type = #tpu.core_type<tc>, window_params = [{transform_indices = @transform_0, window_bounds = array<i64: 128, 128>}, {pipeline_mode = #tpu.pipeline_mode<synchronous>, transform_indices = @transform_1, window_bounds = array<i64: 128, 256>}, {pipeline_mode = #tpu.pipeline_mode<synchronous>, transform_indices = @transform_2, window_bounds = array<i64: 1, 256>}, {pipeline_mode = #tpu.pipeline_mode<synchronous>, transform_indices = @transform_3, window_bounds = array<i64: 256, 8>}, {transform_indices = @transform_4, window_bounds = array<i64: 1, 1>}, {transform_indices = @transform_5, window_bounds = array<i64: 128, 8>}]} {
    %c0 = arith.constant 0 : index
    %c0_0 = arith.constant 0 : index
    %0 = vector.load %arg2[%c0, %c0_0] : memref<128x256xbf16, #tpu.memory_space<vmem>>, vector<128x256xbf16>
    %c0_1 = arith.constant 0 : index
    %c0_2 = arith.constant 0 : index
    %1 = vector.load %arg1[%c0_1, %c0_2] : memref<128x128xf32, #tpu.memory_space<vmem>>, vector<128x128xf32>
    %2 = arith.truncf %1 : vector<128x128xf32> to vector<128x128xbf16>
    %cst = arith.constant dense<0.000000e+00> : vector<128x256xf32>
    %3 = tpu.matmul %2, %0, %cst {dimension_numbers = #tpu.dot_dimension_numbers<[1], [0], [0], [1], [0, 0, 1, 1], [], []>} : vector<128x128xbf16>, vector<128x256xbf16>, vector<128x256xf32> -> vector<128x256xf32>
    %c0_3 = arith.constant 0 : index
    %c0_4 = arith.constant 0 : index
    %4 = vector.load %arg3[%c0_3, %c0_4] : memref<1x256xf32, #tpu.memory_space<vmem>>, vector<1x256xf32>
    %5 = vector.broadcast %4 : vector<1x256xf32> to vector<128x256xf32>
    %6 = arith.addf %3, %5 : vector<128x256xf32>
    %cst_5 = arith.constant 0.000000e+00 : f32
    %7 = vector.broadcast %cst_5 : f32 to vector<128x256xf32>
    %8 = arith.maximumf %6, %7 : vector<128x256xf32>
    %c0_6 = arith.constant 0 : index
    %c0_7 = arith.constant 0 : index
    %9 = vector.load %arg4[%c0_6, %c0_7] : memref<256x8xf32, #tpu.memory_space<vmem>>, vector<256x8xf32>
    %cst_8 = arith.constant dense<0.000000e+00> : vector<128x8xf32>
    %10 = tpu.matmul %8, %9, %cst_8 {dimension_numbers = #tpu.dot_dimension_numbers<[1], [0], [0], [1], [0, 0, 1, 1], [], []>} : vector<128x256xf32>, vector<256x8xf32>, vector<128x8xf32> -> vector<128x8xf32>
    %c0_9 = arith.constant 0 : index
    %c0_10 = arith.constant 0 : index
    %11 = memref.load %arg5[%c0_9, %c0_10] : memref<1x1xf32, #tpu.memory_space<smem>>
    %12 = vector.broadcast %11 : f32 to vector<128x8xf32>
    %13 = arith.addf %10, %12 : vector<128x8xf32>
    %c0_11 = arith.constant 0 : index
    %c0_12 = arith.constant 0 : index
    %14 = vector.load %arg6[%c0_11, %c0_12] : memref<128x8xf32, #tpu.memory_space<vmem>>, vector<128x8xf32>
    tpu.vector_store %arg6[%c0_11, %c0_12], %13 {strides = array<i32>} : memref<128x8xf32, #tpu.memory_space<vmem>>, vector<128x8xf32>,
    return
  }
  func.func @transform_0(%arg0: i32) -> (i32, i32) {
    %c0_i32 = arith.constant 0 : i32
    %c0_i32_0 = arith.constant 0 : i32
    return %arg0, %c0_i32 : i32, i32
  }
  func.func @transform_1(%arg0: i32) -> (i32, i32) {
    %c0_i32 = arith.constant 0 : i32
    %c0_i32_0 = arith.constant 0 : i32
    %c0_i32_1 = arith.constant 0 : i32
    return %c0_i32, %c0_i32_0 : i32, i32
  }
  func.func @transform_2(%arg0: i32) -> (i32, i32) {
    %c0_i32 = arith.constant 0 : i32
    %c0_i32_0 = arith.constant 0 : i32
    %c0_i32_1 = arith.constant 0 : i32
    return %c0_i32, %c0_i32_0 : i32, i32
  }
  func.func @transform_3(%arg0: i32) -> (i32, i32) {
    %c0_i32 = arith.constant 0 : i32
    %c0_i32_0 = arith.constant 0 : i32
    %c0_i32_1 = arith.constant 0 : i32
    return %c0_i32, %c0_i32_0 : i32, i32
  }
  func.func @transform_4(%arg0: i32) -> (i32, i32) {
    %c0_i32 = arith.constant 0 : i32
    %c0_i32_0 = arith.constant 0 : i32
    %c0_i32_1 = arith.constant 0 : i32
    return %c0_i32, %c0_i32_0 : i32, i32
  }
  func.func @transform_5(%arg0: i32) -> (i32, i32) {
    %c0_i32 = arith.constant 0 : i32
    %c0_i32_0 = arith.constant 0 : i32
    return %arg0, %c0_i32 : i32, i32
  }
}

</mosaic_0001>

<bundles_post_ra>
// kernel: tpu_custom_call.1
= control target key start
LH: loop header
LB: loop body
LE: loop exit
PB: predicated region body
PF: predicated region fallthrough
CT: control target
= control target key end

     0   :  { %vm441_vm0 = vcmask 64512   ;;  %s936_s1 = inlined_call_operand.vmem [shape: bf16[128,256], index: 1, kind: input, shape index: {}]   ;;  %s937_s0 = inlined_call_operand.vmem [shape: f32[128,128], index: 0, kind: input, shape index: {}]   ;;  %s938_s3 = inlined_call_operand.vmem [shape: f32[256,8], index: 3, kind: input, shape index: {}]   ;;  %s939_s2 = inlined_call_operand.vmem [shape: f32[1,256], index: 2, kind: input, shape index: {}]   ;;  %s940_s4 = inlined_call_operand.<no memory space> [shape: f32[1,1], index: 4, kind: input, shape index: {}]   ;;  %s941_s5 = inlined_call_operand.vmem [shape: f32[128,8], index: 5, kind: output, shape index: {}]  }
   0x1   :  { %v520_v0 = vld [vmem:[%s936_s1 + $0x70] sm:$0xf]  ;;  %v541_v1 = vld [vmem:[%s936_s1 + $0x74] sm:$0xf0]  ;;  %v540_v2 = vld [vmem:[%s936_s1 + $0x74] sm:$0xf] }
   0x2   :  { %v521_v3 = vor.u32 %v541_v1, %v520_v0  ;;  %v522_v4 = vld [vmem:[%s936_s1 + $0x78] sm:$0xf0]  ;;  %v512_v5 = vld [vmem:[%s936_s1 + $0x60] sm:$0xf]  ;;  %v539_v6 = vld [vmem:[%s936_s1 + $0x64] sm:$0xf0] }
   0x3   :  { %v525_v7 = vor.u32 %v540_v2, %v522_v4  ;;  %v538_v8 = vld [vmem:[%s936_s1 + $0x64] sm:$0xf]  ;;  %v514_v9 = vld [vmem:[%s936_s1 + $0x68] sm:$0xf0]  ;;  %v513_v10 = vor.u32 %v539_v6, %v512_v5  ;;  %v504_v12 = vld [vmem:[%s936_s1 + $0x50] sm:$0xf] }
   0x4   :  { %147 = vmatpush.bf16.msra.mxu0 %v521_v3  ;;  %v517_v11 = vor.u32 %v538_v8, %v514_v9  ;;  %v537_v13 = vld [vmem:[%s936_s1 + $0x54] sm:$0xf0]  ;;  %v536_v14 = vld [vmem:[%s936_s1 + $0x54] sm:$0xf]  ;;  %v506_v15 = vld [vmem:[%s936_s1 + $0x58] sm:$0xf0] }
   0x5   :  { %196 = vmatpush.bf16.msra.mxu1 %v525_v7  ;;  %v505_v16 = vor.u32 %v537_v13, %v504_v12  ;;  %v509_v17 = vor.u32 %v536_v14, %v506_v15  ;;  %v496_v18 = vld [vmem:[%s936_s1 + $0x40] sm:$0xf]  ;;  %v535_v19 = vld [vmem:[%s936_s1 + $0x44] sm:$0xf0]  ;;  %v534_v20 = vld [vmem:[%s936_s1 + $0x44] sm:$0xf] }
   0x6   :  { %v498_v21 = vld [vmem:[%s936_s1 + $0x48] sm:$0xf0]  ;;  %v497_v22 = vor.u32 %v535_v19, %v496_v18  ;;  %v488_v24 = vld [vmem:[%s936_s1 + $0x30] sm:$0xf]  ;;  %v533_v25 = vld [vmem:[%s936_s1 + $0x34] sm:$0xf0] }
   0x7   :  { %v501_v23 = vor.u32 %v534_v20, %v498_v21  ;;  %v532_v26 = vld [vmem:[%s936_s1 + $0x34] sm:$0xf]  ;;  %v490_v27 = vld [vmem:[%s936_s1 + $0x38] sm:$0xf0]  ;;  %v489_v28 = vor.u32 %v533_v25, %v488_v24  ;;  %v480_v30 = vld [vmem:[%s936_s1 + $0x20] sm:$0xf] }
   0x8   :  { %148 = vmatpush.bf16.msra.mxu0 %v513_v10  ;;  %v493_v29 = vor.u32 %v532_v26, %v490_v27  ;;  %v531_v31 = vld [vmem:[%s936_s1 + $0x24] sm:$0xf0]  ;;  %v530_v32 = vld [vmem:[%s936_s1 + $0x24] sm:$0xf]  ;;  %v482_v33 = vld [vmem:[%s936_s1 + $0x28] sm:$0xf0] }
   0x9   :  { %197 = vmatpush.bf16.msra.mxu1 %v517_v11  ;;  %v481_v34 = vor.u32 %v531_v31, %v480_v30  ;;  %v485_v35 = vor.u32 %v530_v32, %v482_v33  ;;  %v472_v36 = vld [vmem:[%s936_s1 + $0x10] sm:$0xf]  ;;  %v529_v37 = vld [vmem:[%s936_s1 + $0x14] sm:$0xf0]  ;;  %v528_v38 = vld [vmem:[%s936_s1 + $0x14] sm:$0xf] }
   0xa   :  { %v474_v39 = vld [vmem:[%s936_s1 + $0x18] sm:$0xf0]  ;;  %v473_v40 = vor.u32 %v529_v37, %v472_v36  ;;  %v464_v42 = vld [vmem:[%s936_s1] sm:$0xf]  ;;  %v527_v43 = vld [vmem:[%s936_s1 + $0x4] sm:$0xf0] }
   0xb   :  { %v477_v41 = vor.u32 %v528_v38, %v474_v39  ;;  %v526_v44 = vld [vmem:[%s936_s1 + $0x4] sm:$0xf]  ;;  %v466_v45 = vld [vmem:[%s936_s1 + $0x8] sm:$0xf0]  ;;  %v465_v46 = vor.u32 %v527_v43, %v464_v42  ;;  %v39_v51 = vld [vmem:[%s937_s0 + $0x10] sm:$0xff] }
   0xc   :  { %149 = vmatpush.bf16.msra.mxu0 %v505_v16  ;;  %v37_v47 = vld [vmem:[%s937_s0] sm:$0xff]  ;;  %v38_v48 = vld [vmem:[%s937_s0 + $0x8] sm:$0xff]  ;;  %v469_v49 = vor.u32 %v526_v44, %v466_v45  ;;  %v40_v52 = vld [vmem:[%s937_s0 + $0x18] sm:$0xff] }
   0xd   :  { %198 = vmatpush.bf16.msra.mxu1 %v509_v17  ;;  %v53_v50 = vpack.c.bf16 %v38_v48, %v37_v47  ;;  %v54_v53 = vpack.c.bf16 %v40_v52, %v39_v51  ;;  %v41_v54 = vld [vmem:[%s937_s0 + $0x20] sm:$0xff]  ;;  %v42_v55 = vld [vmem:[%s937_s0 + $0x28] sm:$0xff]  ;;  %v43_v57 = vld [vmem:[%s937_s0 + $0x30] sm:$0xff] }
   0xe   :  { %v55_v56 = vpack.c.bf16 %v42_v55, %v41_v54  ;;  %v44_v58 = vld [vmem:[%s937_s0 + $0x38] sm:$0xff]  ;;  %v45_v60 = vld [vmem:[%s937_s0 + $0x40] sm:$0xff]  ;;  %v46_v61 = vld [vmem:[%s937_s0 + $0x48] sm:$0xff] }
   0xf   :  { %v56_v59 = vpack.c.bf16 %v44_v58, %v43_v57  ;;  %v57_v62 = vpack.c.bf16 %v46_v61, %v45_v60  ;;  %v292_v63 = vld [vmem:[%s938_s3 + $0x78] sm:$0xff]  ;;  %v291_v1 = vld [vmem:[%s938_s3 + $0x70] sm:$0xff]  ;;  %v290_v3 = vld [vmem:[%s938_s3 + $0x68] sm:$0xff] }
  0x10   :  { %150 = vmatpush.bf16.msra.mxu0 %v497_v22  ;;  %v308_v0 = vld [vmem:[%s938_s3 + $0xf8] sm:$0xff]  ;;  %311 = vmatpush.msra.mxu2 %v292_v63  ;;  %v307_v2 = vld [vmem:[%s938_s3 + $0xf0] sm:$0xff]  ;;  %v306_v4 = vld [vmem:[%s938_s3 + $0xe8] sm:$0xff] }
  0x11   :  { %199 = vmatpush.bf16.msra.mxu1 %v501_v23  ;;  %376 = vmatpush.msra.mxu3 %v308_v0  ;;  %v289_v5 = vld [vmem:[%s938_s3 + $0x60] sm:$0xff]  ;;  %v288_v7 = vld [vmem:[%s938_s3 + $0x58] sm:$0xff]  ;;  %v47_v9 = vld [vmem:[%s937_s0 + $0x50] sm:$0xff] }
  0x12   :  { %312 = vmatpush.msra.mxu2 %v291_v1  ;;  %v305_v6 = vld [vmem:[%s938_s3 + $0xe0] sm:$0xff]  ;;  %v304_v8 = vld [vmem:[%s938_s3 + $0xd8] sm:$0xff]  ;;  %v287_v11 = vld [vmem:[%s938_s3 + $0x50] sm:$0xff] }
  0x13   :  { %377 = vmatpush.msra.mxu3 %v307_v2  ;;  %v48_v10 = vld [vmem:[%s937_s0 + $0x58] sm:$0xff]  ;;  %v303_v12 = vld [vmem:[%s938_s3 + $0xd0] sm:$0xff]  ;;  %v286_v13 = vld [vmem:[%s938_s3 + $0x48] sm:$0xff] }
  0x14   :  { %151 = vmatpush.bf16.msra.mxu0 %v489_v28  ;;  %313 = vmatpush.msra.mxu2 %v290_v3  ;;  %v302_v14 = vld [vmem:[%s938_s3 + $0xc8] sm:$0xff]  ;;  %v58_v15 = vpack.c.bf16 %v48_v10, %v47_v9  ;;  %v285_v16 = vld [vmem:[%s938_s3 + $0x40] sm:$0xff]  ;;  %v284_v18 = vld [vmem:[%s938_s3 + $0x38] sm:$0xff] }
  0x15   :  { %200 = vmatpush.bf16.msra.mxu1 %v493_v29  ;;  %378 = vmatpush.msra.mxu3 %v306_v4  ;;  %v301_v17 = vld [vmem:[%s938_s3 + $0xc0] sm:$0xff]  ;;  %v300_v19 = vld [vmem:[%s938_s3 + $0xb8] sm:$0xff]  ;;  %v283_v20 = vld [vmem:[%s938_s3 + $0x30] sm:$0xff] }
  0x16   :  { %314 = vmatpush.msra.mxu2 %v289_v5  ;;  %v299_v21 = vld [vmem:[%s938_s3 + $0xb0] sm:$0xff]  ;;  %v282_v22 = vld [vmem:[%s938_s3 + $0x28] sm:$0xff]  ;;  %v281_v24 = vld [vmem:[%s938_s3 + $0x20] sm:$0xff] }
  0x17   :  { %379 = vmatpush.msra.mxu3 %v305_v6  ;;  %v298_v23 = vld [vmem:[%s938_s3 + $0xa8] sm:$0xff]  ;;  %v297_v25 = vld [vmem:[%s938_s3 + $0xa0] sm:$0xff]  ;;  %v280_v28 = vld [vmem:[%s938_s3 + $0x18] sm:$0xff] }
  0x18   :  { %152 = vmatpush.bf16.msra.mxu0 %v481_v34  ;;  %315 = vmatpush.msra.mxu2 %v288_v7  ;;  %v49_v26 = vld [vmem:[%s937_s0 + $0x60] sm:$0xff]  ;;  %v50_v27 = vld [vmem:[%s937_s0 + $0x68] sm:$0xff]  ;;  %v296_v29 = vld [vmem:[%s938_s3 + $0x98] sm:$0xff] }
  0x19   :  { %201 = vmatpush.bf16.msra.mxu1 %v485_v35  ;;  %380 = vmatpush.msra.mxu3 %v304_v8  ;;  %v59_v30 = vpack.c.bf16 %v50_v27, %v49_v26  ;;  %v279_v31 = vld [vmem:[%s938_s3 + $0x10] sm:$0xff]  ;;  %v278_v33 = vld [vmem:[%s938_s3 + $0x8] sm:$0xff]  ;;  %v277_v35 = vld [vmem:[%s938_s3] sm:$0xff] }
  0x1a   :  { %316 = vmatpush.msra.mxu2 %v287_v11  ;;  %v295_v32 = vld [vmem:[%s938_s3 + $0x90] sm:$0xff]  ;;  %v294_v34 = vld [vmem:[%s938_s3 + $0x88] sm:$0xff]  ;;  %v293_v36 = vld [vmem:[%s938_s3 + $0x80] sm:$0xff] }
  0x1b   :  { %381 = vmatpush.msra.mxu3 %v303_v12  ;;  %v51_v37 = vld [vmem:[%s937_s0 + $0x70] sm:$0xff]  ;;  %v52_v38 = vld [vmem:[%s937_s0 + $0x78] sm:$0xff] }
  0x1c   :  { %153 = vmatpush.bf16.msra.mxu0 %v473_v40  ;;  %317 = vmatpush.msra.mxu2 %v286_v13  ;;  %v60_v39 = vpack.c.bf16 %v52_v38, %v51_v37  ;;  %v61_v40 = vld [vmem:[%s939_s2] sm:$0x3] }
  0x1d   :  { %202 = vmatpush.bf16.msra.mxu1 %v477_v41  ;;  %382 = vmatpush.msra.mxu3 %v302_v14  ;;  %v815_v41 = vperm.slane %v61_v40, 0  ;;  %v817_v42 = vperm.slane %v61_v40, 1 }
  0x1e   :  { %318 = vmatpush.msra.mxu2 %v285_v16 }
  0x1f   :  { %383 = vmatpush.msra.mxu3 %v301_v17 }
  0x20   :  { %154 = vmatpush.bf16.msra.mxu0 %v465_v46  ;;  %319 = vmatpush.msra.mxu2 %v284_v18 }
  0x21   :  { %203 = vmatpush.bf16.msra.mxu1 %v469_v49  ;;  %384 = vmatpush.msra.mxu3 %v300_v19 }
  0x22   :  { %320 = vmatpush.msra.mxu2 %v283_v20 }
  0x23   :  { %155 = vmatmul.bf16.vlgmr.msra.gmra.mxu0 %v53_v50  ;;  %385 = vmatpush.msra.mxu3 %v299_v21 }
  0x24   :  { %204 = vmatmul.bf16.vlgmr.msra.gmra.mxu1 %v53_v50  ;;  %321 = vmatpush.msra.mxu2 %v282_v22 }
  0x25   :  { %386 = vmatpush.msra.mxu3 %v298_v23 }
  0x26   :  { %322 = vmatpush.msra.mxu2 %v281_v24 }
  0x27   :  { %387 = vmatpush.msra.mxu3 %v297_v25 }
  0x28   :  { %323 = vmatpush.msra.mxu2 %v280_v28 }
  0x29   :  { %388 = vmatpush.msra.mxu3 %v296_v29 }
  0x2a   :  { %324 = vmatpush.msra.mxu2 %v279_v31 }
  0x2b   :  { %389 = vmatpush.msra.mxu3 %v295_v32 }
  0x2c   :  { %325 = vmatpush.msra.mxu2 %v278_v33 }
  0x2d   :  { %390 = vmatpush.msra.mxu3 %v294_v34 }
  0x2e   :  { %326 = vmatpush.msra.mxu2 %v277_v35 }
  0x2f   :  { %391 = vmatpush.msra.mxu3 %v293_v36 }
  0x33   :  { %160 = vmatmul.bf16.gmra.mxu0 %v54_v53 }
  0x34   :  { %209 = vmatmul.bf16.gmra.mxu1 %v54_v53 }
  0x43   :  { %165 = vmatmul.bf16.gmra.mxu0 %v55_v56 }
  0x44   :  { %214 = vmatmul.bf16.gmra.mxu1 %v55_v56 }
  0x53   :  { %170 = vmatmul.bf16.gmra.mxu0 %v56_v59 }
  0x54   :  { %219 = vmatmul.bf16.gmra.mxu1 %v56_v59 }
  0x63   :  { %175 = vmatmul.bf16.gmra.mxu0 %v57_v62 }
  0x64   :  { %224 = vmatmul.bf16.gmra.mxu1 %v57_v62 }
  0x73   :  { %180 = vmatmul.bf16.gmra.mxu0 %v58_v15 }
  0x74   :  { %229 = vmatmul.bf16.gmra.mxu1 %v58_v15 }
  0x83   :  { %185 = vmatmul.bf16.gmra.mxu0 %v59_v30 }
  0x84   :  { %234 = vmatmul.bf16.gmra.mxu1 %v59_v30 }
  0x93   :  { %190 = vmatmul.bf16.gmra.mxu0 %v60_v39 }
  0x94   :  { %239 = vmatmul.bf16.gmra.mxu1 %v60_v39 }
  0xa0   :  { %v156_v43 = vpop.f32.mrf.mxu0 }
  0xa1   :  { %v157_v44 = vadd.f32 %v156_v43, %v815_v41  ;;  %v205_v45 = vpop.f32.mrf.mxu1 }
  0xa2   :  { %v206_v46 = vadd.f32 %v205_v45, %v817_v42 }
  0xa3   :  { %v245_v47 = vmax.f32 %v157_v44, 0.0 }
  0xa4   :  { %v246_v48 = vmax.f32 %v206_v46, 0.0 }
  0xa5   :  { %327 = vmatmul.f32.vlgmr.msra.gmra.mxu2 %v245_v47 }
  0xa6   :  { %392 = vmatmul.f32.vlgmr.msra.gmra.mxu3 %v246_v48 }
  0xa8   :  { %v158_v49 = vpop.f32.mrf.mxu0 }
  0xa9   :  { %v159_v50 = vadd.f32 %v158_v49, %v815_v41  ;;  %v207_v51 = vpop.f32.mrf.mxu1 }
  0xaa   :  { %v208_v52 = vadd.f32 %v207_v51, %v817_v42 }
  0xab   :  { %v247_v53 = vmax.f32 %v159_v50, 0.0 }
  0xac   :  { %v248_v54 = vmax.f32 %v208_v52, 0.0 }
  0xad   :  { %330 = vmatmul.f32.gmra.mxu2 %v247_v53 }
  0xae   :  { %395 = vmatmul.f32.gmra.mxu3 %v248_v54 }
  0xb0   :  { %v161_v55 = vpop.f32.mrf.mxu0 }
  0xb1   :  { %v162_v56 = vadd.f32 %v161_v55, %v815_v41  ;;  %v210_v57 = vpop.f32.mrf.mxu1 }
  0xb2   :  { %v211_v58 = vadd.f32 %v210_v57, %v817_v42 }
  0xb3   :  { %v249_v59 = vmax.f32 %v162_v56, 0.0 }
  0xb4   :  { %v250_v60 = vmax.f32 %v211_v58, 0.0 }
  0xb5   :  { %333 = vmatmul.f32.gmra.mxu2 %v249_v59 }
  0xb6   :  { %398 = vmatmul.f32.gmra.mxu3 %v250_v60 }
  0xb8   :  { %v163_v61 = vpop.f32.mrf.mxu0 }
  0xb9   :  { %v164_v62 = vadd.f32 %v163_v61, %v815_v41  ;;  %v212_v63 = vpop.f32.mrf.mxu1 }
  0xba   :  { %v213_v0 = vadd.f32 %v212_v63, %v817_v42 }
  0xbb   :  { %v251_v1 = vmax.f32 %v164_v62, 0.0 }
  0xbc   :  { %v252_v2 = vmax.f32 %v213_v0, 0.0 }
  0xbd   :  { %336 = vmatmul.f32.gmra.mxu2 %v251_v1 }
  0xbe   :  { %401 = vmatmul.f32.gmra.mxu3 %v252_v2 }
  0xc0   :  { %v166_v3 = vpop.f32.mrf.mxu0 }
  0xc1   :  { %v167_v4 = vadd.f32 %v166_v3, %v815_v41  ;;  %v215_v5 = vpop.f32.mrf.mxu1 }
  0xc2   :  { %v216_v6 = vadd.f32 %v215_v5, %v817_v42 }
  0xc3   :  { %v253_v7 = vmax.f32 %v167_v4, 0.0 }
  0xc4   :  { %v254_v8 = vmax.f32 %v216_v6, 0.0 }
  0xc5   :  { %339 = vmatmul.f32.gmra.mxu2 %v253_v7 }
  0xc6   :  { %404 = vmatmul.f32.gmra.mxu3 %v254_v8 }
  0xc8   :  { %v168_v9 = vpop.f32.mrf.mxu0 }
  0xc9   :  { %v169_v10 = vadd.f32 %v168_v9, %v815_v41  ;;  %v217_v11 = vpop.f32.mrf.mxu1 }
  0xca   :  { %v218_v12 = vadd.f32 %v217_v11, %v817_v42 }
  0xcb   :  { %v255_v13 = vmax.f32 %v169_v10, 0.0 }
  0xcc   :  { %v256_v14 = vmax.f32 %v218_v12, 0.0 }
  0xcd   :  { %342 = vmatmul.f32.gmra.mxu2 %v255_v13  ;;  %v854_v13 = vstv %s940_s4 }
  0xce   :  { %407 = vmatmul.f32.gmra.mxu3 %v256_v14 }
  0xd0   :  { %v171_v15 = vpop.f32.mrf.mxu0 }
  0xd1   :  { %v172_v16 = vadd.f32 %v171_v15, %v815_v41  ;;  %v220_v17 = vpop.f32.mrf.mxu1 }
  0xd2   :  { %v221_v18 = vadd.f32 %v220_v17, %v817_v42 }
  0xd3   :  { %v257_v19 = vmax.f32 %v172_v16, 0.0 }
  0xd4   :  { %v258_v20 = vmax.f32 %v221_v18, 0.0 }
  0xd5   :  { %345 = vmatmul.f32.gmra.mxu2 %v257_v19 }
  0xd6   :  { %410 = vmatmul.f32.gmra.mxu3 %v258_v20 }
  0xd8   :  { %v173_v21 = vpop.f32.mrf.mxu0 }
  0xd9   :  { %v174_v22 = vadd.f32 %v173_v21, %v815_v41  ;;  %v222_v23 = vpop.f32.mrf.mxu1 }
  0xda   :  { %v223_v24 = vadd.f32 %v222_v23, %v817_v42 }
  0xdb   :  { %v259_v25 = vmax.f32 %v174_v22, 0.0 }
  0xdc   :  { %v260_v26 = vmax.f32 %v223_v24, 0.0 }
  0xdd   :  { %348 = vmatmul.f32.gmra.mxu2 %v259_v25 }
  0xde   :  { %413 = vmatmul.f32.gmra.mxu3 %v260_v26 }
  0xe0   :  { %v176_v27 = vpop.f32.mrf.mxu0 }
  0xe1   :  { %v177_v28 = vadd.f32 %v176_v27, %v815_v41  ;;  %v225_v29 = vpop.f32.mrf.mxu1 }
  0xe2   :  { %v226_v30 = vadd.f32 %v225_v29, %v817_v42 }
  0xe3   :  { %v261_v31 = vmax.f32 %v177_v28, 0.0 }
  0xe4   :  { %v262_v32 = vmax.f32 %v226_v30, 0.0 }
  0xe5   :  { %351 = vmatmul.f32.gmra.mxu2 %v261_v31 }
  0xe6   :  { %416 = vmatmul.f32.gmra.mxu3 %v262_v32 }
  0xe8   :  { %v178_v33 = vpop.f32.mrf.mxu0 }
  0xe9   :  { %v179_v34 = vadd.f32 %v178_v33, %v815_v41  ;;  %v227_v35 = vpop.f32.mrf.mxu1 }
  0xea   :  { %v228_v36 = vadd.f32 %v227_v35, %v817_v42 }
  0xeb   :  { %v263_v37 = vmax.f32 %v179_v34, 0.0 }
  0xec   :  { %v264_v38 = vmax.f32 %v228_v36, 0.0 }
  0xed   :  { %354 = vmatmul.f32.gmra.mxu2 %v263_v37 }
  0xee   :  { %419 = vmatmul.f32.gmra.mxu3 %v264_v38 }
  0xf0   :  { %v181_v39 = vpop.f32.mrf.mxu0 }
  0xf1   :  { %v182_v40 = vadd.f32 %v181_v39, %v815_v41  ;;  %v230_v43 = vpop.f32.mrf.mxu1 }
  0xf2   :  { %v231_v44 = vadd.f32 %v230_v43, %v817_v42 }
  0xf3   :  { %v265_v45 = vmax.f32 %v182_v40, 0.0 }
  0xf4   :  { %v266_v46 = vmax.f32 %v231_v44, 0.0 }
  0xf5   :  { %357 = vmatmul.f32.gmra.mxu2 %v265_v45 }
  0xf6   :  { %422 = vmatmul.f32.gmra.mxu3 %v266_v46 }
  0xf8   :  { %v183_v47 = vpop.f32.mrf.mxu0 }
  0xf9   :  { %v184_v48 = vadd.f32 %v183_v47, %v815_v41  ;;  %v232_v49 = vpop.f32.mrf.mxu1 }
  0xfa   :  { %v233_v50 = vadd.f32 %v232_v49, %v817_v42 }
  0xfb   :  { %v267_v51 = vmax.f32 %v184_v48, 0.0 }
  0xfc   :  { %v268_v52 = vmax.f32 %v233_v50, 0.0 }
  0xfd   :  { %360 = vmatmul.f32.gmra.mxu2 %v267_v51 }
  0xfe   :  { %425 = vmatmul.f32.gmra.mxu3 %v268_v52 }
 0x100   :  { %v186_v53 = vpop.f32.mrf.mxu0 }
 0x101   :  { %v187_v54 = vadd.f32 %v186_v53, %v815_v41  ;;  %v235_v55 = vpop.f32.mrf.mxu1 }
 0x102   :  { %v236_v56 = vadd.f32 %v235_v55, %v817_v42 }
 0x103   :  { %v269_v57 = vmax.f32 %v187_v54, 0.0 }
 0x104   :  { %v270_v58 = vmax.f32 %v236_v56, 0.0 }
 0x105   :  { %363 = vmatmul.f32.gmra.mxu2 %v269_v57 }
 0x106   :  { %428 = vmatmul.f32.gmra.mxu3 %v270_v58 }
 0x108   :  { %v188_v59 = vpop.f32.mrf.mxu0 }
 0x109   :  { %v189_v60 = vadd.f32 %v188_v59, %v815_v41  ;;  %v237_v61 = vpop.f32.mrf.mxu1 }
 0x10a   :  { %v238_v62 = vadd.f32 %v237_v61, %v817_v42 }
 0x10b   :  { %v271_v63 = vmax.f32 %v189_v60, 0.0 }
 0x10c   :  { %v272_v0 = vmax.f32 %v238_v62, 0.0 }
 0x10d   :  { %366 = vmatmul.f32.gmra.mxu2 %v271_v63 }
 0x10e   :  { %431 = vmatmul.f32.gmra.mxu3 %v272_v0 }
 0x110   :  { %v191_v1 = vpop.f32.mrf.mxu0 }
 0x111   :  { %v192_v2 = vadd.f32 %v191_v1, %v815_v41  ;;  %v240_v3 = vpop.f32.mrf.mxu1 }
 0x112   :  { %v241_v4 = vadd.f32 %v240_v3, %v817_v42 }
 0x113   :  { %v273_v5 = vmax.f32 %v192_v2, 0.0 }
 0x114   :  { %v274_v6 = vmax.f32 %v241_v4, 0.0 }
 0x115   :  { %369 = vmatmul.f32.gmra.mxu2 %v273_v5 }
 0x116   :  { %434 = vmatmul.f32.gmra.mxu3 %v274_v6 }
 0x118   :  { %v193_v7 = vpop.f32.mrf.mxu0 }
 0x119   :  { %v194_v8 = vadd.f32 %v193_v7, %v815_v41  ;;  %v242_v9 = vpop.f32.mrf.mxu1 }
 0x11a   :  { %v243_v10 = vadd.f32 %v242_v9, %v817_v42 }
 0x11b   :  { %v275_v11 = vmax.f32 %v194_v8, 0.0 }
 0x11c   :  { %v276_v12 = vmax.f32 %v243_v10, 0.0 }
 0x11d   :  { %372 = vmatmul.f32.gmra.mxu2 %v275_v11 }
 0x11e   :  { %437 = vmatmul.f32.gmra.mxu3 %v276_v12 }
 0x128   :  { %v328_v14 = vpop.f32.mrf.mxu2 }
 0x129   :  { %v329_v15 = vadd.f32 %v328_v14, %v854_v13  ;;  %v393_v16 = vpop.f32.mrf.mxu3 }
 0x12b   :  { %v394_v17 = vadd.f32 %v393_v16, %v329_v15 }
 0x12d   :  { %442 = vst.msk [vmem:[%s941_s5] sm:$0xff] %vm441_vm0, %v394_v17 }
 0x130   :  { %v331_v41 = vpop.f32.mrf.mxu2 }
 0x131   :  { %v332_v42 = vadd.f32 %v331_v41, %v854_v13  ;;  %v396_v18 = vpop.f32.mrf.mxu3 }
 0x133   :  { %v397_v19 = vadd.f32 %v396_v18, %v332_v42 }
 0x135   :  { %443 = vst.msk [vmem:[%s941_s5 + $0x8] sm:$0xff] %vm441_vm0, %v397_v19 }
 0x138   :  { %v334_v20 = vpop.f32.mrf.mxu2 }
 0x139   :  { %v335_v21 = vadd.f32 %v334_v20, %v854_v13  ;;  %v399_v22 = vpop.f32.mrf.mxu3 }
 0x13b   :  { %v400_v23 = vadd.f32 %v399_v22, %v335_v21 }
 0x13d   :  { %444 = vst.msk [vmem:[%s941_s5 + $0x10] sm:$0xff] %vm441_vm0, %v400_v23 }
 0x140   :  { %v337_v24 = vpop.f32.mrf.mxu2 }
 0x141   :  { %v338_v25 = vadd.f32 %v337_v24, %v854_v13  ;;  %v402_v26 = vpop.f32.mrf.mxu3 }
 0x143   :  { %v403_v27 = vadd.f32 %v402_v26, %v338_v25 }
 0x145   :  { %445 = vst.msk [vmem:[%s941_s5 + $0x18] sm:$0xff] %vm441_vm0, %v403_v27 }
 0x148   :  { %v340_v28 = vpop.f32.mrf.mxu2 }
 0x149   :  { %v341_v29 = vadd.f32 %v340_v28, %v854_v13  ;;  %v405_v30 = vpop.f32.mrf.mxu3 }
 0x14b   :  { %v406_v31 = vadd.f32 %v405_v30, %v341_v29 }
 0x14d   :  { %446 = vst.msk [vmem:[%s941_s5 + $0x20] sm:$0xff] %vm441_vm0, %v406_v31 }
 0x150   :  { %v343_v32 = vpop.f32.mrf.mxu2 }
 0x151   :  { %v344_v33 = vadd.f32 %v343_v32, %v854_v13  ;;  %v408_v34 = vpop.f32.mrf.mxu3 }
 0x153   :  { %v409_v35 = vadd.f32 %v408_v34, %v344_v33 }
 0x155   :  { %447 = vst.msk [vmem:[%s941_s5 + $0x28] sm:$0xff] %vm441_vm0, %v409_v35 }
 0x158   :  { %v346_v36 = vpop.f32.mrf.mxu2 }
 0x159   :  { %v347_v37 = vadd.f32 %v346_v36, %v854_v13  ;;  %v411_v38 = vpop.f32.mrf.mxu3 }
 0x15b   :  { %v412_v39 = vadd.f32 %v411_v38, %v347_v37 }
 0x15d   :  { %448 = vst.msk [vmem:[%s941_s5 + $0x30] sm:$0xff] %vm441_vm0, %v412_v39 }
 0x160   :  { %v349_v40 = vpop.f32.mrf.mxu2 }
 0x161   :  { %v350_v43 = vadd.f32 %v349_v40, %v854_v13  ;;  %v414_v44 = vpop.f32.mrf.mxu3 }
 0x163   :  { %v415_v45 = vadd.f32 %v414_v44, %v350_v43 }
 0x165   :  { %449 = vst.msk [vmem:[%s941_s5 + $0x38] sm:$0xff] %vm441_vm0, %v415_v45 }
 0x168   :  { %v352_v46 = vpop.f32.mrf.mxu2 }
 0x169   :  { %v353_v47 = vadd.f32 %v352_v46, %v854_v13  ;;  %v417_v48 = vpop.f32.mrf.mxu3 }
 0x16b   :  { %v418_v49 = vadd.f32 %v417_v48, %v353_v47 }
 0x16d   :  { %450 = vst.msk [vmem:[%s941_s5 + $0x40] sm:$0xff] %vm441_vm0, %v418_v49 }
 0x170   :  { %v355_v50 = vpop.f32.mrf.mxu2 }
 0x171   :  { %v356_v51 = vadd.f32 %v355_v50, %v854_v13  ;;  %v420_v52 = vpop.f32.mrf.mxu3 }
 0x173   :  { %v421_v53 = vadd.f32 %v420_v52, %v356_v51 }
 0x175   :  { %451 = vst.msk [vmem:[%s941_s5 + $0x48] sm:$0xff] %vm441_vm0, %v421_v53 }
 0x178   :  { %v358_v54 = vpop.f32.mrf.mxu2 }
 0x179   :  { %v359_v55 = vadd.f32 %v358_v54, %v854_v13  ;;  %v423_v56 = vpop.f32.mrf.mxu3 }
 0x17b   :  { %v424_v57 = vadd.f32 %v423_v56, %v359_v55 }
 0x17d   :  { %452 = vst.msk [vmem:[%s941_s5 + $0x50] sm:$0xff] %vm441_vm0, %v424_v57 }
 0x180   :  { %v361_v58 = vpop.f32.mrf.mxu2 }
 0x181   :  { %v362_v59 = vadd.f32 %v361_v58, %v854_v13  ;;  %v426_v60 = vpop.f32.mrf.mxu3 }
 0x183   :  { %v427_v61 = vadd.f32 %v426_v60, %v362_v59 }
 0x185   :  { %453 = vst.msk [vmem:[%s941_s5 + $0x58] sm:$0xff] %vm441_vm0, %v427_v61 }
 0x188   :  { %v364_v62 = vpop.f32.mrf.mxu2 }
 0x189   :  { %v365_v63 = vadd.f32 %v364_v62, %v854_v13  ;;  %v429_v0 = vpop.f32.mrf.mxu3 }
 0x18b   :  { %v430_v1 = vadd.f32 %v429_v0, %v365_v63 }
 0x18d   :  { %454 = vst.msk [vmem:[%s941_s5 + $0x60] sm:$0xff] %vm441_vm0, %v430_v1 }
 0x190   :  { %v367_v2 = vpop.f32.mrf.mxu2 }
 0x191   :  { %v368_v3 = vadd.f32 %v367_v2, %v854_v13  ;;  %v432_v4 = vpop.f32.mrf.mxu3 }
 0x193   :  { %v433_v5 = vadd.f32 %v432_v4, %v368_v3 }
 0x195   :  { %455 = vst.msk [vmem:[%s941_s5 + $0x68] sm:$0xff] %vm441_vm0, %v433_v5 }
 0x198   :  { %v370_v6 = vpop.f32.mrf.mxu2 }
 0x199   :  { %v371_v7 = vadd.f32 %v370_v6, %v854_v13  ;;  %v435_v8 = vpop.f32.mrf.mxu3 }
 0x19b   :  { %v436_v9 = vadd.f32 %v435_v8, %v371_v7 }
 0x19d   :  { %456 = vst.msk [vmem:[%s941_s5 + $0x70] sm:$0xff] %vm441_vm0, %v436_v9 }
 0x1a0   :  { %v373_v10 = vpop.f32.mrf.mxu2 }
 0x1a1   :  { %v374_v11 = vadd.f32 %v373_v10, %v854_v13  ;;  %v438_v12 = vpop.f32.mrf.mxu3 }
 0x1a3   :  { %v439_v14 = vadd.f32 %v438_v12, %v374_v11 }
 0x1a5   :  { %457 = vst.msk [vmem:[%s941_s5 + $0x78] sm:$0xff] %vm441_vm0, %v439_v14 }

</bundles_post_ra>
